<compile_context>
chip_gen: v6e
topology: v6e:2x2x1
jax: 0.10.0
libtpu: 0.0.40
codegen_flags: <defaults>
</compile_context>

<pallas_src>
import jax
import jax.numpy as jnp
from jax import lax
from jax.experimental import pallas as pl
from jax.experimental.pallas import tpu as pltpu

# ---- module hyperparameters (mirrors the PyTorch __init__) -----------------
VOCAB_SIZE = 100          # synthetic vocab
EMBEDDING_DIM = 64
HIDDEN_SIZE = 64
N_LAYERS = 2
N_CLASSES = 3
DROPOUT_PROB = 0.2        # eval-mode dropout == identity
LN_EPS = 1e-5

FC1_DIM = 16
FC1_PAD = 128             # lane-dense padded fc1 width
OUT_PAD = 128             # lane-dense padded logits width

# small example shapes
BATCH = 2
SEQ = 8


def _sentiment_kernel(x0_ref,                        # (T*Bp, H) layer-0 preacts (x@Wih0 + b0)
                      whh0_ref,                      # (H, H)
                      wih1_ref, b1_ref,              # (H, H), (1, H)
                      whh1_ref,                      # (H, H)
                      gamma_ref, beta_ref,           # (1, H), (1, H)
                      w1_ref, bb1_ref,               # (H, FC1_PAD), (1, FC1_PAD)
                      w2_ref, bb2_ref,               # (FC1_PAD, OUT_PAD), (1, OUT_PAD)
                      out_ref,                       # (Bp, OUT_PAD)
                      h0_seq_ref):                   # VMEM scratch (T*Bp, H)
    TB, H = x0_ref.shape
    Bp = out_ref.shape[0]
    T = TB // Bp

    whh0 = whh0_ref[...]
    whh1 = whh1_ref[...]

    # ---- layer-0 recurrence: one (Bp,H)@(H,H) MXU matmul per step ----------
    # (input projection + both biases were folded into the embedding table)
    h0 = jnp.zeros((Bp, H), jnp.float32)
    for t in range(T):                               # static unroll, T small
        x_t = x0_ref[pl.ds(t * Bp, Bp), :]
        h0 = jnp.tanh(x_t + jnp.dot(h0, whh0, preferred_element_type=jnp.float32))
        h0_seq_ref[pl.ds(t * Bp, Bp), :] = h0

    # ---- layer-1 input projection: one batched (T*Bp,H)@(H,H) matmul -------
    z1 = (jnp.dot(h0_seq_ref[...], wih1_ref[...],
                  preferred_element_type=jnp.float32)
          + b1_ref[...])                             # bias added once, batched

    # ---- layer-1 recurrence: one (Bp,H)@(H,H) MXU matmul per step ----------
    h1 = jnp.zeros((Bp, H), jnp.float32)
    for t in range(T):                               # static unroll
        h1 = jnp.tanh(z1[t * Bp:(t + 1) * Bp, :]
                      + jnp.dot(h1, whh1, preferred_element_type=jnp.float32))

    # ---- LayerNorm over the feature axis (biased variance, like PyTorch) ---
    mean = jnp.mean(h1, axis=-1, keepdims=True)
    centered = h1 - mean
    var = jnp.mean(centered * centered, axis=-1, keepdims=True)
    xn = centered * lax.rsqrt(var + LN_EPS)
    xn = xn * gamma_ref[...] + beta_ref[...]

    # Dropout in eval mode is the identity.
    # TODO(synk): training-mode dropout (random mask / (1-p) scaling) not implemented.

    # ---- MLP head: fc1 -> ReLU -> fc2 (lane-dense, zero-padded columns) ----
    z = jnp.dot(xn, w1_ref[...], preferred_element_type=jnp.float32) + bb1_ref[...]
    z = jnp.maximum(z, 0.0)
    out_ref[...] = jnp.dot(z, w2_ref[...], preferred_element_type=jnp.float32) + bb2_ref[...]


def sentiment_classifier_forward(token_ids, params):
    """token_ids: (B, T) int32 -> logits (B, N_CLASSES) f32."""
    B, T = token_ids.shape
    Bp = max(8, ((B + 7) // 8) * 8)                  # pad batch to full sublanes

    # Fold the layer-0 input projection and fused bias into the embedding table
    # (done once, V=100 rows, outside the recurrent critical path).
    emb_proj = (jnp.dot(params["embedding"], params["w_ih0"],
                        preferred_element_type=jnp.float32)
                + params["b0"])                      # (V, H)

    # Time-major gather straight from the projected table (no activation
    # transpose), padded batch rows use token 0 and are sliced off at the end.
    ids_tm = jnp.pad(token_ids.T, ((0, 0), (0, Bp - B)))          # (T, Bp)
    x0 = emb_proj[ids_tm].reshape(T * Bp, HIDDEN_SIZE)            # (T*Bp, H)

    # Lane-dense head: zero-pad fc1/fc2 output widths to 128 columns.
    fc1_w = jnp.pad(params["fc1_w"], ((0, 0), (0, FC1_PAD - FC1_DIM)))
    fc1_b = jnp.pad(params["fc1_b"], ((0, 0), (0, FC1_PAD - FC1_DIM)))
    fc2_w = jnp.pad(params["fc2_w"], ((0, FC1_PAD - FC1_DIM), (0, OUT_PAD - N_CLASSES)))
    fc2_b = jnp.pad(params["fc2_b"], ((0, 0), (0, OUT_PAD - N_CLASSES)))

    vmem = pl.BlockSpec(memory_space=pltpu.MemorySpace.VMEM)
    args = (
        x0,
        params["w_hh0"],
        params["w_ih1"], params["b1"],
        params["w_hh1"],
        params["ln_gamma"], params["ln_beta"],
        fc1_w, fc1_b,
        fc2_w, fc2_b,
    )
    out_pad = pl.pallas_call(
        _sentiment_kernel,
        out_shape=jax.ShapeDtypeStruct((Bp, OUT_PAD), jnp.float32),
        in_specs=[vmem] * len(args),
        out_specs=vmem,
        scratch_shapes=[pltpu.VMEM((T * Bp, HIDDEN_SIZE), jnp.float32)],
    )(*args)
    # TODO(synk): if B grows, add a batch grid axis with
    # dimension_semantics=("parallel",) so v7x's two TensorCores both get work.
    return out_pad[:B, :N_CLASSES]


def init_params(key):
    ks = jax.random.split(key, 16)
    u = lambda k, shape, scale: jax.random.uniform(
        k, shape, jnp.float32, minval=-scale, maxval=scale)
    s_rnn = 1.0 / jnp.sqrt(HIDDEN_SIZE)
    return {
        "embedding": jax.random.normal(ks[0], (VOCAB_SIZE, EMBEDDING_DIM), jnp.float32),
        # layer 0: EMBEDDING_DIM -> HIDDEN_SIZE  (stored as (in, out))
        "w_ih0": u(ks[1], (EMBEDDING_DIM, HIDDEN_SIZE), s_rnn),
        "w_hh0": u(ks[2], (HIDDEN_SIZE, HIDDEN_SIZE), s_rnn),
        "b0": u(ks[3], (1, HIDDEN_SIZE), s_rnn) + u(ks[4], (1, HIDDEN_SIZE), s_rnn),  # b_ih + b_hh
        # layer 1: HIDDEN_SIZE -> HIDDEN_SIZE
        "w_ih1": u(ks[5], (HIDDEN_SIZE, HIDDEN_SIZE), s_rnn),
        "w_hh1": u(ks[6], (HIDDEN_SIZE, HIDDEN_SIZE), s_rnn),
        "b1": u(ks[7], (1, HIDDEN_SIZE), s_rnn) + u(ks[8], (1, HIDDEN_SIZE), s_rnn),
        # LayerNorm
        "ln_gamma": jnp.ones((1, HIDDEN_SIZE), jnp.float32),
        "ln_beta": jnp.zeros((1, HIDDEN_SIZE), jnp.float32),
        # fc1: 64 -> 16
        "fc1_w": u(ks[9], (HIDDEN_SIZE, FC1_DIM), 1.0 / jnp.sqrt(HIDDEN_SIZE)),
        "fc1_b": u(ks[10], (1, FC1_DIM), 1.0 / jnp.sqrt(HIDDEN_SIZE)),
        # fc2: 16 -> 3
        "fc2_w": u(ks[11], (FC1_DIM, N_CLASSES), 1.0 / jnp.sqrt(16.0)),
        "fc2_b": u(ks[12], (1, N_CLASSES), 1.0 / jnp.sqrt(16.0)),
    }


if __name__ == "__main__":
    key = jax.random.PRNGKey(0)
    pkey, xkey = jax.random.split(key)
    params = init_params(pkey)
    token_ids = jax.random.randint(xkey, (BATCH, SEQ), 0, VOCAB_SIZE, dtype=jnp.int32)

    logits = sentiment_classifier_forward(token_ids, params)
    jax.block_until_ready(logits)
    assert logits.shape == (BATCH, N_CLASSES)
    assert logits.dtype == jnp.float32
    print("KERNEL_OK")
</pallas_src>

<mosaic_0001>
module attributes {stable_mosaic.version = 11 : i64} {
  func.func @_sentiment_kernel(%arg0: memref<64x64xf32, #tpu.memory_space<vmem>>, %arg1: memref<64x64xf32, #tpu.memory_space<vmem>>, %arg2: memref<64x64xf32, #tpu.memory_space<vmem>>, %arg3: memref<1x64xf32, #tpu.memory_space<vmem>>, %arg4: memref<64x64xf32, #tpu.memory_space<vmem>>, %arg5: memref<1x64xf32, #tpu.memory_space<vmem>>, %arg6: memref<1x64xf32, #tpu.memory_space<vmem>>, %arg7: memref<64x128xf32, #tpu.memory_space<vmem>>, %arg8: memref<1x128xf32, #tpu.memory_space<vmem>>, %arg9: memref<128x128xf32, #tpu.memory_space<vmem>>, %arg10: memref<1x128xf32, #tpu.memory_space<vmem>>, %arg11: memref<8x128xf32, #tpu.memory_space<vmem>>, %arg12: memref<64x64xf32, #tpu.memory_space<vmem>>) attributes {dimension_semantics = [], scalar_prefetch = 0 : i64, scratch_operands = 1 : i64, tpu.core_type = #tpu.core_type<tc>} {
    %c0 = arith.constant 0 : index
    %c0_0 = arith.constant 0 : index
    %0 = vector.load %arg1[%c0, %c0_0] : memref<64x64xf32, #tpu.memory_space<vmem>>, vector<64x64xf32>
    %c0_1 = arith.constant 0 : index
    %c0_2 = arith.constant 0 : index
    %1 = vector.load %arg4[%c0_1, %c0_2] : memref<64x64xf32, #tpu.memory_space<vmem>>, vector<64x64xf32>
    %cst = arith.constant 0.000000e+00 : f32
    %2 = vector.broadcast %cst : f32 to vector<8x64xf32>
    %c0_3 = arith.constant 0 : index
    %c0_4 = arith.constant 0 : index
    %3 = vector.load %arg0[%c0_3, %c0_4] : memref<64x64xf32, #tpu.memory_space<vmem>>, vector<8x64xf32>
    %cst_5 = arith.constant dense<0.000000e+00> : vector<8x64xf32>
    %4 = tpu.matmul %2, %0, %cst_5 {dimension_numbers = #tpu.dot_dimension_numbers<[1], [0], [0], [1], [0, 0, 1, 1], [], []>} : vector<8x64xf32>, vector<64x64xf32>, vector<8x64xf32> -> vector<8x64xf32>
    %5 = arith.addf %3, %4 : vector<8x64xf32>
    %6 = math.tanh %5 : vector<8x64xf32>
    %c0_6 = arith.constant 0 : index
    %c0_7 = arith.constant 0 : index
    %7 = vector.load %arg12[%c0_6, %c0_7] : memref<64x64xf32, #tpu.memory_space<vmem>>, vector<8x64xf32>
    tpu.vector_store %arg12[%c0_6, %c0_7], %6 {strides = array<i32>} : memref<64x64xf32, #tpu.memory_space<vmem>>, vector<8x64xf32>,
    %c8 = arith.constant 8 : index
    %c0_8 = arith.constant 0 : index
    %8 = vector.load %arg0[%c8, %c0_8] : memref<64x64xf32, #tpu.memory_space<vmem>>, vector<8x64xf32>
    %cst_9 = arith.constant dense<0.000000e+00> : vector<8x64xf32>
    %9 = tpu.matmul %6, %0, %cst_9 {dimension_numbers = #tpu.dot_dimension_numbers<[1], [0], [0], [1], [0, 0, 1, 1], [], []>} : vector<8x64xf32>, vector<64x64xf32>, vector<8x64xf32> -> vector<8x64xf32>
    %10 = arith.addf %8, %9 : vector<8x64xf32>
    %11 = math.tanh %10 : vector<8x64xf32>
    %c8_10 = arith.constant 8 : index
    %c0_11 = arith.constant 0 : index
    %12 = vector.load %arg12[%c8_10, %c0_11] : memref<64x64xf32, #tpu.memory_space<vmem>>, vector<8x64xf32>
    tpu.vector_store %arg12[%c8_10, %c0_11], %11 {strides = array<i32>} : memref<64x64xf32, #tpu.memory_space<vmem>>, vector<8x64xf32>,
    %c16 = arith.constant 16 : index
    %c0_12 = arith.constant 0 : index
    %13 = vector.load %arg0[%c16, %c0_12] : memref<64x64xf32, #tpu.memory_space<vmem>>, vector<8x64xf32>
    %cst_13 = arith.constant dense<0.000000e+00> : vector<8x64xf32>
    %14 = tpu.matmul %11, %0, %cst_13 {dimension_numbers = #tpu.dot_dimension_numbers<[1], [0], [0], [1], [0, 0, 1, 1], [], []>} : vector<8x64xf32>, vector<64x64xf32>, vector<8x64xf32> -> vector<8x64xf32>
    %15 = arith.addf %13, %14 : vector<8x64xf32>
    %16 = math.tanh %15 : vector<8x64xf32>
    %c16_14 = arith.constant 16 : index
    %c0_15 = arith.constant 0 : index
    %17 = vector.load %arg12[%c16_14, %c0_15] : memref<64x64xf32, #tpu.memory_space<vmem>>, vector<8x64xf32>
    tpu.vector_store %arg12[%c16_14, %c0_15], %16 {strides = array<i32>} : memref<64x64xf32, #tpu.memory_space<vmem>>, vector<8x64xf32>,
    %c24 = arith.constant 24 : index
    %c0_16 = arith.constant 0 : index
    %18 = vector.load %arg0[%c24, %c0_16] : memref<64x64xf32, #tpu.memory_space<vmem>>, vector<8x64xf32>
    %cst_17 = arith.constant dense<0.000000e+00> : vector<8x64xf32>
    %19 = tpu.matmul %16, %0, %cst_17 {dimension_numbers = #tpu.dot_dimension_numbers<[1], [0], [0], [1], [0, 0, 1, 1], [], []>} : vector<8x64xf32>, vector<64x64xf32>, vector<8x64xf32> -> vector<8x64xf32>
    %20 = arith.addf %18, %19 : vector<8x64xf32>
    %21 = math.tanh %20 : vector<8x64xf32>
    %c24_18 = arith.constant 24 : index
    %c0_19 = arith.constant 0 : index
    %22 = vector.load %arg12[%c24_18, %c0_19] : memref<64x64xf32, #tpu.memory_space<vmem>>, vector<8x64xf32>
    tpu.vector_store %arg12[%c24_18, %c0_19], %21 {strides = array<i32>} : memref<64x64xf32, #tpu.memory_space<vmem>>, vector<8x64xf32>,
    %c32 = arith.constant 32 : index
    %c0_20 = arith.constant 0 : index
    %23 = vector.load %arg0[%c32, %c0_20] : memref<64x64xf32, #tpu.memory_space<vmem>>, vector<8x64xf32>
    %cst_21 = arith.constant dense<0.000000e+00> : vector<8x64xf32>
    %24 = tpu.matmul %21, %0, %cst_21 {dimension_numbers = #tpu.dot_dimension_numbers<[1], [0], [0], [1], [0, 0, 1, 1], [], []>} : vector<8x64xf32>, vector<64x64xf32>, vector<8x64xf32> -> vector<8x64xf32>
    %25 = arith.addf %23, %24 : vector<8x64xf32>
    %26 = math.tanh %25 : vector<8x64xf32>
    %c32_22 = arith.constant 32 : index
    %c0_23 = arith.constant 0 : index
    %27 = vector.load %arg12[%c32_22, %c0_23] : memref<64x64xf32, #tpu.memory_space<vmem>>, vector<8x64xf32>
    tpu.vector_store %arg12[%c32_22, %c0_23], %26 {strides = array<i32>} : memref<64x64xf32, #tpu.memory_space<vmem>>, vector<8x64xf32>,
    %c40 = arith.constant 40 : index
    %c0_24 = arith.constant 0 : index
    %28 = vector.load %arg0[%c40, %c0_24] : memref<64x64xf32, #tpu.memory_space<vmem>>, vector<8x64xf32>
    %cst_25 = arith.constant dense<0.000000e+00> : vector<8x64xf32>
    %29 = tpu.matmul %26, %0, %cst_25 {dimension_numbers = #tpu.dot_dimension_numbers<[1], [0], [0], [1], [0, 0, 1, 1], [], []>} : vector<8x64xf32>, vector<64x64xf32>, vector<8x64xf32> -> vector<8x64xf32>
    %30 = arith.addf %28, %29 : vector<8x64xf32>
    %31 = math.tanh %30 : vector<8x64xf32>
    %c40_26 = arith.constant 40 : index
    %c0_27 = arith.constant 0 : index
    %32 = vector.load %arg12[%c40_26, %c0_27] : memref<64x64xf32, #tpu.memory_space<vmem>>, vector<8x64xf32>
    tpu.vector_store %arg12[%c40_26, %c0_27], %31 {strides = array<i32>} : memref<64x64xf32, #tpu.memory_space<vmem>>, vector<8x64xf32>,
    %c48 = arith.constant 48 : index
    %c0_28 = arith.constant 0 : index
    %33 = vector.load %arg0[%c48, %c0_28] : memref<64x64xf32, #tpu.memory_space<vmem>>, vector<8x64xf32>
    %cst_29 = arith.constant dense<0.000000e+00> : vector<8x64xf32>
    %34 = tpu.matmul %31, %0, %cst_29 {dimension_numbers = #tpu.dot_dimension_numbers<[1], [0], [0], [1], [0, 0, 1, 1], [], []>} : vector<8x64xf32>, vector<64x64xf32>, vector<8x64xf32> -> vector<8x64xf32>
    %35 = arith.addf %33, %34 : vector<8x64xf32>
    %36 = math.tanh %35 : vector<8x64xf32>
    %c48_30 = arith.constant 48 : index
    %c0_31 = arith.constant 0 : index
    %37 = vector.load %arg12[%c48_30, %c0_31] : memref<64x64xf32, #tpu.memory_space<vmem>>, vector<8x64xf32>
    tpu.vector_store %arg12[%c48_30, %c0_31], %36 {strides = array<i32>} : memref<64x64xf32, #tpu.memory_space<vmem>>, vector<8x64xf32>,
    %c56 = arith.constant 56 : index
    %c0_32 = arith.constant 0 : index
    %38 = vector.load %arg0[%c56, %c0_32] : memref<64x64xf32, #tpu.memory_space<vmem>>, vector<8x64xf32>
    %cst_33 = arith.constant dense<0.000000e+00> : vector<8x64xf32>
    %39 = tpu.matmul %36, %0, %cst_33 {dimension_numbers = #tpu.dot_dimension_numbers<[1], [0], [0], [1], [0, 0, 1, 1], [], []>} : vector<8x64xf32>, vector<64x64xf32>, vector<8x64xf32> -> vector<8x64xf32>
    %40 = arith.addf %38, %39 : vector<8x64xf32>
    %41 = math.tanh %40 : vector<8x64xf32>
    %c56_34 = arith.constant 56 : index
    %c0_35 = arith.constant 0 : index
    %42 = vector.load %arg12[%c56_34, %c0_35] : memref<64x64xf32, #tpu.memory_space<vmem>>, vector<8x64xf32>
    tpu.vector_store %arg12[%c56_34, %c0_35], %41 {strides = array<i32>} : memref<64x64xf32, #tpu.memory_space<vmem>>, vector<8x64xf32>,
    %c0_36 = arith.constant 0 : index
    %c0_37 = arith.constant 0 : index
    %43 = vector.load %arg12[%c0_36, %c0_37] : memref<64x64xf32, #tpu.memory_space<vmem>>, vector<64x64xf32>
    %c0_38 = arith.constant 0 : index
    %c0_39 = arith.constant 0 : index
    %44 = vector.load %arg2[%c0_38, %c0_39] : memref<64x64xf32, #tpu.memory_space<vmem>>, vector<64x64xf32>
    %cst_40 = arith.constant dense<0.000000e+00> : vector<64x64xf32>
    %45 = tpu.matmul %43, %44, %cst_40 {dimension_numbers = #tpu.dot_dimension_numbers<[1], [0], [0], [1], [0, 0, 1, 1], [], []>} : vector<64x64xf32>, vector<64x64xf32>, vector<64x64xf32> -> vector<64x64xf32>
    %c0_41 = arith.constant 0 : index
    %c0_42 = arith.constant 0 : index
    %46 = vector.load %arg3[%c0_41, %c0_42] : memref<1x64xf32, #tpu.memory_space<vmem>>, vector<1x64xf32>
    %47 = vector.broadcast %46 : vector<1x64xf32> to vector<64x64xf32>
    %48 = arith.addf %45, %47 : vector<64x64xf32>
    %cst_43 = arith.constant 0.000000e+00 : f32
    %49 = vector.broadcast %cst_43 : f32 to vector<8x64xf32>
    %50 = vector.extract_strided_slice %48 {offsets = [0, 0], sizes = [8, 64], strides = [1, 1]} : vector<64x64xf32> to vector<8x64xf32>
    %cst_44 = arith.constant dense<0.000000e+00> : vector<8x64xf32>
    %51 = tpu.matmul %49, %1, %cst_44 {dimension_numbers = #tpu.dot_dimension_numbers<[1], [0], [0], [1], [0, 0, 1, 1], [], []>} : vector<8x64xf32>, vector<64x64xf32>, vector<8x64xf32> -> vector<8x64xf32>
    %52 = arith.addf %50, %51 : vector<8x64xf32>
    %53 = math.tanh %52 : vector<8x64xf32>
    %54 = vector.extract_strided_slice %48 {offsets = [8, 0], sizes = [8, 64], strides = [1, 1]} : vector<64x64xf32> to vector<8x64xf32>
    %cst_45 = arith.constant dense<0.000000e+00> : vector<8x64xf32>
    %55 = tpu.matmul %53, %1, %cst_45 {dimension_numbers = #tpu.dot_dimension_numbers<[1], [0], [0], [1], [0, 0, 1, 1], [], []>} : vector<8x64xf32>, vector<64x64xf32>, vector<8x64xf32> -> vector<8x64xf32>
    %56 = arith.addf %54, %55 : vector<8x64xf32>
    %57 = math.tanh %56 : vector<8x64xf32>
    %58 = vector.extract_strided_slice %48 {offsets = [16, 0], sizes = [8, 64], strides = [1, 1]} : vector<64x64xf32> to vector<8x64xf32>
    %cst_46 = arith.constant dense<0.000000e+00> : vector<8x64xf32>
    %59 = tpu.matmul %57, %1, %cst_46 {dimension_numbers = #tpu.dot_dimension_numbers<[1], [0], [0], [1], [0, 0, 1, 1], [], []>} : vector<8x64xf32>, vector<64x64xf32>, vector<8x64xf32> -> vector<8x64xf32>
    %60 = arith.addf %58, %59 : vector<8x64xf32>
    %61 = math.tanh %60 : vector<8x64xf32>
    %62 = vector.extract_strided_slice %48 {offsets = [24, 0], sizes = [8, 64], strides = [1, 1]} : vector<64x64xf32> to vector<8x64xf32>
    %cst_47 = arith.constant dense<0.000000e+00> : vector<8x64xf32>
    %63 = tpu.matmul %61, %1, %cst_47 {dimension_numbers = #tpu.dot_dimension_numbers<[1], [0], [0], [1], [0, 0, 1, 1], [], []>} : vector<8x64xf32>, vector<64x64xf32>, vector<8x64xf32> -> vector<8x64xf32>
    %64 = arith.addf %62, %63 : vector<8x64xf32>
    %65 = math.tanh %64 : vector<8x64xf32>
    %66 = vector.extract_strided_slice %48 {offsets = [32, 0], sizes = [8, 64], strides = [1, 1]} : vector<64x64xf32> to vector<8x64xf32>
    %cst_48 = arith.constant dense<0.000000e+00> : vector<8x64xf32>
    %67 = tpu.matmul %65, %1, %cst_48 {dimension_numbers = #tpu.dot_dimension_numbers<[1], [0], [0], [1], [0, 0, 1, 1], [], []>} : vector<8x64xf32>, vector<64x64xf32>, vector<8x64xf32> -> vector<8x64xf32>
    %68 = arith.addf %66, %67 : vector<8x64xf32>
    %69 = math.tanh %68 : vector<8x64xf32>
    %70 = vector.extract_strided_slice %48 {offsets = [40, 0], sizes = [8, 64], strides = [1, 1]} : vector<64x64xf32> to vector<8x64xf32>
    %cst_49 = arith.constant dense<0.000000e+00> : vector<8x64xf32>
    %71 = tpu.matmul %69, %1, %cst_49 {dimension_numbers = #tpu.dot_dimension_numbers<[1], [0], [0], [1], [0, 0, 1, 1], [], []>} : vector<8x64xf32>, vector<64x64xf32>, vector<8x64xf32> -> vector<8x64xf32>
    %72 = arith.addf %70, %71 : vector<8x64xf32>
    %73 = math.tanh %72 : vector<8x64xf32>
    %74 = vector.extract_strided_slice %48 {offsets = [48, 0], sizes = [8, 64], strides = [1, 1]} : vector<64x64xf32> to vector<8x64xf32>
    %cst_50 = arith.constant dense<0.000000e+00> : vector<8x64xf32>
    %75 = tpu.matmul %73, %1, %cst_50 {dimension_numbers = #tpu.dot_dimension_numbers<[1], [0], [0], [1], [0, 0, 1, 1], [], []>} : vector<8x64xf32>, vector<64x64xf32>, vector<8x64xf32> -> vector<8x64xf32>
    %76 = arith.addf %74, %75 : vector<8x64xf32>
    %77 = math.tanh %76 : vector<8x64xf32>
    %78 = vector.extract_strided_slice %48 {offsets = [56, 0], sizes = [8, 64], strides = [1, 1]} : vector<64x64xf32> to vector<8x64xf32>
    %cst_51 = arith.constant dense<0.000000e+00> : vector<8x64xf32>
    %79 = tpu.matmul %77, %1, %cst_51 {dimension_numbers = #tpu.dot_dimension_numbers<[1], [0], [0], [1], [0, 0, 1, 1], [], []>} : vector<8x64xf32>, vector<64x64xf32>, vector<8x64xf32> -> vector<8x64xf32>
    %80 = arith.addf %78, %79 : vector<8x64xf32>
    %81 = math.tanh %80 : vector<8x64xf32>
    %cst_52 = arith.constant dense<0.000000e+00> : vector<8xf32>
    %82 = vector.multi_reduction <add>, %81, %cst_52 [1] : vector<8x64xf32> to vector<8xf32>
    %83 = vector.shape_cast %82 : vector<8xf32> to vector<8x1xf32>
    %cst_53 = arith.constant 6.400000e+01 : f32
    %84 = vector.broadcast %cst_53 : f32 to vector<8x1xf32>
    %85 = arith.divf %83, %84 : vector<8x1xf32>
    %86 = vector.broadcast %85 : vector<8x1xf32> to vector<8x64xf32>
    %87 = arith.subf %81, %86 : vector<8x64xf32>
    %88 = arith.mulf %87, %87 : vector<8x64xf32>
    %cst_54 = arith.constant dense<0.000000e+00> : vector<8xf32>
    %89 = vector.multi_reduction <add>, %88, %cst_54 [1] : vector<8x64xf32> to vector<8xf32>
    %90 = vector.shape_cast %89 : vector<8xf32> to vector<8x1xf32>
    %cst_55 = arith.constant 6.400000e+01 : f32
    %91 = vector.broadcast %cst_55 : f32 to vector<8x1xf32>
    %92 = arith.divf %90, %91 : vector<8x1xf32>
    %cst_56 = arith.constant 9.99999974E-6 : f32
    %93 = vector.broadcast %cst_56 : f32 to vector<8x1xf32>
    %94 = arith.addf %92, %93 : vector<8x1xf32>
    %95 = math.rsqrt %94 : vector<8x1xf32>
    %96 = vector.broadcast %95 : vector<8x1xf32> to vector<8x64xf32>
    %97 = arith.mulf %87, %96 : vector<8x64xf32>
    %c0_57 = arith.constant 0 : index
    %c0_58 = arith.constant 0 : index
    %98 = vector.load %arg5[%c0_57, %c0_58] : memref<1x64xf32, #tpu.memory_space<vmem>>, vector<1x64xf32>
    %99 = vector.broadcast %98 : vector<1x64xf32> to vector<8x64xf32>
    %100 = arith.mulf %97, %99 : vector<8x64xf32>
    %c0_59 = arith.constant 0 : index
    %c0_60 = arith.constant 0 : index
    %101 = vector.load %arg6[%c0_59, %c0_60] : memref<1x64xf32, #tpu.memory_space<vmem>>, vector<1x64xf32>
    %102 = vector.broadcast %101 : vector<1x64xf32> to vector<8x64xf32>
    %103 = arith.addf %100, %102 : vector<8x64xf32>
    %c0_61 = arith.constant 0 : index
    %c0_62 = arith.constant 0 : index
    %104 = vector.load %arg7[%c0_61, %c0_62] : memref<64x128xf32, #tpu.memory_space<vmem>>, vector<64x128xf32>
    %cst_63 = arith.constant dense<0.000000e+00> : vector<8x128xf32>
    %105 = tpu.matmul %103, %104, %cst_63 {dimension_numbers = #tpu.dot_dimension_numbers<[1], [0], [0], [1], [0, 0, 1, 1], [], []>} : vector<8x64xf32>, vector<64x128xf32>, vector<8x128xf32> -> vector<8x128xf32>
    %c0_64 = arith.constant 0 : index
    %c0_65 = arith.constant 0 : index
    %106 = vector.load %arg8[%c0_64, %c0_65] : memref<1x128xf32, #tpu.memory_space<vmem>>, vector<1x128xf32>
    %107 = vector.broadcast %106 : vector<1x128xf32> to vector<8x128xf32>
    %108 = arith.addf %105, %107 : vector<8x128xf32>
    %cst_66 = arith.constant 0.000000e+00 : f32
    %109 = vector.broadcast %cst_66 : f32 to vector<8x128xf32>
    %110 = arith.maximumf %108, %109 : vector<8x128xf32>
    %c0_67 = arith.constant 0 : index
    %c0_68 = arith.constant 0 : index
    %111 = vector.load %arg9[%c0_67, %c0_68] : memref<128x128xf32, #tpu.memory_space<vmem>>, vector<128x128xf32>
    %cst_69 = arith.constant dense<0.000000e+00> : vector<8x128xf32>
    %112 = tpu.matmul %110, %111, %cst_69 {dimension_numbers = #tpu.dot_dimension_numbers<[1], [0], [0], [1], [0, 0, 1, 1], [], []>} : vector<8x128xf32>, vector<128x128xf32>, vector<8x128xf32> -> vector<8x128xf32>
    %c0_70 = arith.constant 0 : index
    %c0_71 = arith.constant 0 : index
    %113 = vector.load %arg10[%c0_70, %c0_71] : memref<1x128xf32, #tpu.memory_space<vmem>>, vector<1x128xf32>
    %114 = vector.broadcast %113 : vector<1x128xf32> to vector<8x128xf32>
    %115 = arith.addf %112, %114 : vector<8x128xf32>
    %c0_72 = arith.constant 0 : index
    %c0_73 = arith.constant 0 : index
    %116 = vector.load %arg11[%c0_72, %c0_73] : memref<8x128xf32, #tpu.memory_space<vmem>>, vector<8x128xf32>
    tpu.vector_store %arg11[%c0_72, %c0_73], %115 {strides = array<i32>} : memref<8x128xf32, #tpu.memory_space<vmem>>, vector<8x128xf32>,
    return
  }
}

</mosaic_0001>

<bundles_post_ra>
// kernel: tpu_custom_call.1
= control target key start
LH: loop header
LB: loop body
LE: loop exit
PB: predicated region body
PF: predicated region fallthrough
CT: control target
= control target key end

     0   :  { %16 = vsyncpa [#allocation4], 0  ;;  %s3064_s0 = inlined_call_operand.hbm [shape: f32[64,64], index: 0, kind: input, shape index: {}]   ;;  %s3065_s1 = inlined_call_operand.hbm [shape: f32[64,64], index: 1, kind: input, shape index: {}]   ;;  %s3066_s2 = inlined_call_operand.hbm [shape: f32[64,64], index: 2, kind: input, shape index: {}]   ;;  %s3067_s3 = inlined_call_operand.vmem [shape: f32[1,64], index: 3, kind: input, shape index: {}]   ;;  %s3068_s4 = inlined_call_operand.hbm [shape: f32[64,64], index: 4, kind: input, shape index: {}]   ;;  %s3069_s5 = inlined_call_operand.vmem [shape: f32[1,64], index: 5, kind: input, shape index: {}]   ;;  %s3070_s6 = inlined_call_operand.vmem [shape: f32[1,64], index: 6, kind: input, shape index: {}]   ;;  %s3071_s7 = inlined_call_operand.hbm [shape: f32[64,128], index: 7, kind: input, shape index: {}]   ;;  %s3072_s8 = inlined_call_operand.vmem [shape: f32[1,128], index: 8, kind: input, shape index: {}]   ;;  %s3073_s9 = inlined_call_operand.hbm [shape: f32[128,128], index: 9, kind: input, shape index: {}]   ;;  %s3074_s10 = inlined_call_operand.vmem [shape: f32[1,128], index: 10, kind: input, shape index: {}]   ;;  %s3075_s11 = inlined_call_operand.hbm [shape: f32[8,128], index: 11, kind: output, shape index: {}]  }
   0x1   :  { %17 = vsyncpa [#allocation7], 0 }
   0x2   :  { %18 = vsyncpa [#allocation10], 0 }
   0x3   :  { %19 = vsyncpa [#allocation13], 0 }
   0x4   :  { %20 = vsyncpa [#allocation5], 0  ;;  %s2529_s17 = smov [#allocation6]   ;;  %s2530_s19 = smov [#allocation9]  }
   0x5   :  { %s38_s18 = sshll.u32 %s2529_s17, 4  ;;  %s64_s20 = sshll.u32 %s2530_s19, 4  ;;  %s39_s18 = int_to_ptr.vmem [resolvable:$true] %s38_s18  ;;  %s65_s20 = int_to_ptr.vmem [resolvable:$true] %s64_s20 }
   0x6   :  { %s2387_s21 = scalar_lea.vmem %s39_s18, 1024  ;;  %p2392_p1 = scmp.lt.s32.totalorder %s39_s18, %s39_s18 }
   0x7   :  { %p2388_p0 = scmp.ne.s32.totalorder %s39_s18, %s2387_s21  ;;  %p2393_p2 = scmp.lt.s32.totalorder %s2387_s21, %s2387_s21 }
   0x9   :  { %p2394_p3 = por %p2393_p2, %p2392_p1 }
   0xb   :  { %p2395_p4 = pnand %p2394_p3, %p2388_p0 }
   0xd   :  { %2398 = shalt.err (!%p2395_p4)
}
   0xe   :  { %s2531_s22 = smov 128   ;;  %s2532_s23 = smov 8  }
   0xf   :  { %44 = dma.hbm_to_vmem [thread:$0]  %s3065_s1, 1024, %s39_s18, [#allocation7], %s2531_s22, %s2531_s22, %s2532_s23  }
  0x10   :  { %s2407_s26 = scalar_lea.vmem %s65_s20, 1024  ;;  %p2412_p6 = scmp.lt.s32.totalorder %s65_s20, %s65_s20 }
  0x11   :  { %p2408_p5 = scmp.ne.s32.totalorder %s65_s20, %s2407_s26  ;;  %p2413_p7 = scmp.lt.s32.totalorder %s2407_s26, %s2407_s26 }
  0x13   :  { %p2414_p8 = por %p2413_p7, %p2412_p6 }
  0x15   :  { %p2415_p9 = pnand %p2414_p8, %p2408_p5 }
  0x17   :  { %2418 = shalt.err (!%p2415_p9)
}
  0x18   :  { %70 = dma.hbm_to_vmem [thread:$0]  %s3068_s4, 1024, %s65_s20, [#allocation10], %s2531_s22, %s2531_s22, %s2532_s23  }
  0x19   :  { %s2533_s29 = smov [#allocation3]   ;;  %s2534_s12 = smov [#allocation8]  }
  0x1a   :  { %s26_s30 = sshll.u32 %s2533_s29, 4  ;;  %s50_s13 = sshll.u32 %s2534_s12, 4  ;;  %s27_s30 = int_to_ptr.vmem [resolvable:$true] %s26_s30  ;;  %s51_s13 = int_to_ptr.vmem [resolvable:$true] %s50_s13 }
  0x1b   :  { %s2427_s1 = scalar_lea.vmem %s27_s30, 1024  ;;  %p2432_p11 = scmp.lt.s32.totalorder %s27_s30, %s27_s30 }
  0x1c   :  { %p2428_p10 = scmp.ne.s32.totalorder %s27_s30, %s2427_s1  ;;  %p2433_p12 = scmp.lt.s32.totalorder %s2427_s1, %s2427_s1 }
  0x1e   :  { %p2434_p13 = por %p2433_p12, %p2432_p11 }
  0x20   :  { %p2435_p0 = pnand %p2434_p13, %p2428_p10 }
  0x22   :  { %2438 = shalt.err (!%p2435_p0)
}
  0x23   :  { %32 = dma.hbm_to_vmem [thread:$0]  %s3064_s0, 1024, %s27_s30, [#allocation4], %s2531_s22, %s2531_s22, %s2532_s23  }
  0x24   :  { %s2447_s4 = scalar_lea.vmem %s51_s13, 1024  ;;  %p2452_p2 = scmp.lt.s32.totalorder %s51_s13, %s51_s13 }
  0x25   :  { %p2448_p1 = scmp.ne.s32.totalorder %s51_s13, %s2447_s4  ;;  %p2453_p3 = scmp.lt.s32.totalorder %s2447_s4, %s2447_s4 }
  0x27   :  { %p2454_p4 = por %p2453_p3, %p2452_p2 }
  0x29   :  { %p2455_p5 = pnand %p2454_p4, %p2448_p1 }
  0x2b   :  { %2458 = shalt.err (!%p2455_p5)
}
  0x2c   :  { %56 = dma.hbm_to_vmem [thread:$0]  %s3066_s2, 1024, %s51_s13, [#allocation7], %s2531_s22, %s2531_s22, %s2532_s23  }
  0x2d   :  { %s2535_s18 = smov [#allocation11]   ;;  %s2536_s20 = smov [#allocation12]  }
  0x2e   :  { %s80_s19 = sshll.u32 %s2535_s18, 4  ;;  %s94_s21 = sshll.u32 %s2536_s20, 4  ;;  %s81_s19 = int_to_ptr.vmem [resolvable:$true] %s80_s19  ;;  %s95_s21 = int_to_ptr.vmem [resolvable:$true] %s94_s21 }
  0x2f   :  { %s2467_s0 = scalar_lea.vmem %s81_s19, 1024  ;;  %p2472_p7 = scmp.lt.s32.totalorder %s81_s19, %s81_s19 }
  0x30   :  { %p2468_p6 = scmp.ne.s32.totalorder %s81_s19, %s2467_s0  ;;  %p2473_p8 = scmp.lt.s32.totalorder %s2467_s0, %s2467_s0 }
  0x32   :  { %p2474_p9 = por %p2473_p8, %p2472_p7 }
  0x34   :  { %p2475_p10 = pnand %p2474_p9, %p2468_p6 }
  0x36   :  { %2478 = shalt.err (!%p2475_p10)
}
  0x37   :  { %86 = dma.hbm_to_vmem [thread:$0]  %s3071_s7, 1024, %s81_s19, [#allocation10], %s2531_s22, %s2531_s22, %s2532_s23  }
  0x38   :  { %s2487_s2 = scalar_lea.vmem %s95_s21, 2048  ;;  %p2492_p12 = scmp.lt.s32.totalorder %s95_s21, %s95_s21 }
  0x39   :  { %p2488_p11 = scmp.ne.s32.totalorder %s95_s21, %s2487_s2  ;;  %p2493_p13 = scmp.lt.s32.totalorder %s2487_s2, %s2487_s2 }
  0x3b   :  { %p2494_p0 = por %p2493_p13, %p2492_p12 }
  0x3d   :  { %p2495_p1 = pnand %p2494_p0, %p2488_p11 }
  0x3f   :  { %2498 = shalt.err (!%p2495_p1)
}
  0x40   :  { %100 = dma.hbm_to_vmem [thread:$0]  %s3073_s9, 2048, %s95_s21, [#allocation13], %s2531_s22, %s2531_s22, %s2532_s23  }
  0x41   :  { %2519 = dma.done.wait [#allocation4], 1024  }
  0x42   :  { %2520 = vsyncadd [#allocation4], 4294966272 }
  0x43   :  { %2521 = dma.done.wait [#allocation7], 2048  }
  0x44   :  { %2522 = vsyncadd [#allocation7], 4294965248 }
  0x45   :  { %2523 = dma.done.wait [#allocation10], 2048  }
  0x46   :  { %2524 = vsyncadd [#allocation10], 4294965248 }
  0x47   :  { %2525 = dma.done.wait [#allocation13], 2048  }
  0x48   :  { %2526 = vsyncadd [#allocation13], 4294965248  ;;  %v2537_v0 = vmov 0.0   ;;  %vm2538_vm0 = vmmov 0   ;;  %v2642_v1 = vld [vmem:[#allocation6 + $0x38] sm:$0xff]  ;;  %v2644_v2 = vld [vmem:[#allocation6 + $0x30] sm:$0xff] }
  0x49   :  { %1948 = vmatprep.subr.mxu1 %v2537_v0  ;;  %1964 = vmatprep.mubr.msk.f32.mxu1 %vm2538_vm0, %v2537_v0  ;;  %v2649_v3 = vld [vmem:[#allocation6 + $0x28] sm:$0xff]  ;;  %v2655_v4 = vld [vmem:[#allocation6 + $0x20] sm:$0xff]  ;;  %v2661_v5 = vld [vmem:[#allocation6 + $0x18] sm:$0xff]  ;;  %vm138_vm1 = vcmask 523264   ;;  %s2539_s12 = smov [#allocation14]  }
  0x4a   :  { %1986 = vmatprep.subr.mxu0 %v2537_v0  ;;  %2002 = vmatprep.mubr.msk.f32.mxu0 %vm2538_vm0, %v2537_v0  ;;  %v2667_v6 = vld [vmem:[#allocation6 + $0x10] sm:$0xff]  ;;  %v2673_v7 = vld [vmem:[#allocation6 + $0x8] sm:$0xff]  ;;  %v2679_v8 = vld [vmem:[#allocation6] sm:$0xff]  ;;  %s1722_s13 = sshll.u32 %s2539_s12, 4  ;;  %s1723_s13 = int_to_ptr.vmem [resolvable:$true] %s1722_s13 }
  0x4b   :  { %1949 = vmatpush3.msra.mxu1 %v2642_v1  ;;  %1987 = vmatpush3.msra.mxu0 %v2642_v1  ;;  %v137_v9 = vld [vmem:[#allocation3] sm:$0xff]  ;;  %v215_v14 = vld [vmem:[#allocation3 + $0x8] sm:$0xff]  ;;  %v292_v19 = vld [vmem:[#allocation3 + $0x10] sm:$0xff]  ;;  %s2499_s1 = scalar_lea.vmem %s1723_s13, 128  ;;  %p2504_p3 = scmp.lt.s32.totalorder %s1723_s13, %s1723_s13 }
  0x4c   :  { %1950 = vmatprep.subr.mxu1 %v2537_v0  ;;  %1988 = vmatprep.subr.mxu0 %v2537_v0  ;;  %v369_v24 = vld [vmem:[#allocation3 + $0x18] sm:$0xff]  ;;  %v446_v29 = vld [vmem:[#allocation3 + $0x20] sm:$0xff]  ;;  %v523_v35 = vld [vmem:[#allocation3 + $0x28] sm:$0xff]  ;;  %p2500_p2 = scmp.ne.s32.totalorder %s1723_s13, %s2499_s1  ;;  %p2505_p4 = scmp.lt.s32.totalorder %s2499_s1, %s2499_s1 }
  0x4d   :  { %1951 = vmatpush3.msra.mxu1 %v2644_v2  ;;  %1989 = vmatpush3.msra.mxu0 %v2644_v2  ;;  %v769_v34 = vld [vmem:[#allocation8 + $0x38] sm:$0xff]  ;;  %v768_v40 = vld [vmem:[#allocation8 + $0x30] sm:$0xff]  ;;  %v767_v42 = vld [vmem:[#allocation8 + $0x28] sm:$0xff] }
  0x4e   :  { %1952 = vmatprep.subr.mxu1 %v2537_v0  ;;  %1990 = vmatprep.subr.mxu0 %v2537_v0  ;;  %v766_v43 = vld [vmem:[#allocation8 + $0x20] sm:$0xff]  ;;  %v765_v44 = vld [vmem:[#allocation8 + $0x18] sm:$0xff]  ;;  %v764_v45 = vld [vmem:[#allocation8 + $0x10] sm:$0xff]  ;;  %p2506_p5 = por %p2505_p4, %p2504_p3 }
  0x4f   :  { %1953 = vmatpush3.msra.mxu1 %v2649_v3  ;;  %1991 = vmatpush3.msra.mxu0 %v2649_v3  ;;  %v763_v46 = vld [vmem:[#allocation8 + $0x8] sm:$0xff]  ;;  %v762_v47 = vld [vmem:[#allocation8] sm:$0xff]  ;;  %v2817_v53 = vld [vmem:[#allocation9 + $0x38] sm:$0xff] }
  0x50   :  { %1954 = vmatprep.subr.mxu1 %v2537_v0  ;;  %1992 = vmatprep.subr.mxu0 %v2537_v0  ;;  %v2820_v54 = vld [vmem:[#allocation9 + $0x30] sm:$0xff]  ;;  %v2824_v55 = vld [vmem:[#allocation9 + $0x28] sm:$0xff]  ;;  %v2828_v56 = vld [vmem:[#allocation9 + $0x20] sm:$0xff]  ;;  %p2507_p6 = pnand %p2506_p5, %p2500_p2 }
  0x51   :  { %1955 = vmatpush3.msra.mxu1 %v2655_v4  ;;  %1993 = vmatpush3.msra.mxu0 %v2655_v4  ;;  %v2832_v57 = vld [vmem:[#allocation9 + $0x18] sm:$0xff]  ;;  %v2836_v58 = vld [vmem:[#allocation9 + $0x10] sm:$0xff]  ;;  %v2840_v59 = vld [vmem:[#allocation9 + $0x8] sm:$0xff] }
  0x52   :  { %1956 = vmatprep.subr.mxu1 %v2537_v0  ;;  %1994 = vmatprep.subr.mxu0 %v2537_v0  ;;  %v2844_v60 = vld [vmem:[#allocation9] sm:$0xff]  ;;  %v600_v61 = vld [vmem:[#allocation3 + $0x30] sm:$0xff] }
  0x53   :  { %1957 = vmatpush3.msra.mxu1 %v2661_v5  ;;  %1995 = vmatpush3.msra.mxu0 %v2661_v5 }
  0x54   :  { %1958 = vmatprep.subr.mxu1 %v2537_v0  ;;  %1996 = vmatprep.subr.mxu0 %v2537_v0 }
  0x55   :  { %1959 = vmatpush3.msra.mxu1 %v2667_v6  ;;  %1997 = vmatpush3.msra.mxu0 %v2667_v6 }
  0x56   :  { %1960 = vmatprep.subr.mxu1 %v2537_v0  ;;  %1998 = vmatprep.subr.mxu0 %v2537_v0 }
  0x57   :  { %1961 = vmatpush3.msra.mxu1 %v2673_v7  ;;  %1999 = vmatpush3.msra.mxu0 %v2673_v7 }
  0x58   :  { %1962 = vmatprep.subr.mxu1 %v2537_v0  ;;  %2000 = vmatprep.subr.mxu0 %v2537_v0 }
  0x59   :  { %1963 = vmatpush3.msra.mxu1 %v2679_v8  ;;  %2001 = vmatpush3.msra.mxu0 %v2679_v8 }
  0x5a   :  { %1965 = vmatmul.mubr.f32.vlgmr.msra.gmra.mxu1 %v2537_v0  ;;  %1967 = vmatprep.subr.mxu1 %v2537_v0 }
  0x5b   :  { %1968 = vmatpush3.msra.mxu1 %v2642_v1  ;;  %1983 = vmatprep.mubr.msk.f32.mxu1 %vm2538_vm0, %v2537_v0 }
  0x5c   :  { %1969 = vmatprep.subr.mxu1 %v2537_v0  ;;  %2024 = vmatprep.subr.mxu0 %v2537_v0 }
  0x5d   :  { %1970 = vmatpush3.msra.mxu1 %v2644_v2 }
  0x5e   :  { %1971 = vmatprep.subr.mxu1 %v2537_v0 }
  0x5f   :  { %1972 = vmatpush3.msra.mxu1 %v2649_v3 }
  0x60   :  { %1973 = vmatprep.subr.mxu1 %v2537_v0 }
  0x61   :  { %1974 = vmatpush3.msra.mxu1 %v2655_v4 }
  0x62   :  { %1975 = vmatprep.subr.mxu1 %v2537_v0 }
  0x63   :  { %1976 = vmatpush3.msra.mxu1 %v2661_v5 }
  0x64   :  { %1977 = vmatprep.subr.mxu1 %v2537_v0 }
  0x65   :  { %1978 = vmatpush3.msra.mxu1 %v2667_v6 }
  0x66   :  { %1979 = vmatprep.subr.mxu1 %v2537_v0 }
  0x67   :  { %1980 = vmatpush3.msra.mxu1 %v2673_v7 }
  0x68   :  { %1981 = vmatprep.subr.mxu1 %v2537_v0 }
  0x69   :  { %1982 = vmatpush3.msra.mxu1 %v2679_v8 }
  0x6a   :  { %2005 = vmatprep.subr.mxu1 %v2537_v0 }
 0x11a   :  { %v208_v10 = vpop.f32.mrf.mxu1 }
 0x11b   :  { %v212_v11 = vadd.f32 %v208_v10, %v137_v9  ;;  %v2892_v10 = vld [vmem:[%s3067_s3] ss:$0 sm:$0xff] }
 0x11c   :  { %v1966_v12 = vpop.f32.mrf.mxu1 }
 0x11d   :  { %2345 = vtanh.f32 %v212_v11 }
 0x12a   :  { %v2346_v13 = vpop.eup %2345 }
 0x12b   :  { %214 = vst.msk [vmem:[#allocation2] sm:$0xff] %vm138_vm1, %v2346_v13  ;;  %1984 = vmatmul.mubr.msk.f32.vlgmr.msra.gmra.mxu1 %vm138_vm1, %v2346_v13 }
 0x12c   :  { %2006 = vmatpush3.msra.mxu1 %v2642_v1  ;;  %2021 = vmatprep.mubr.msk.f32.mxu1 %vm2538_vm0, %v2537_v0 }
 0x12d   :  { %2007 = vmatprep.subr.mxu1 %v2537_v0 }
 0x12e   :  { %2008 = vmatpush3.msra.mxu1 %v2644_v2 }
 0x12f   :  { %2009 = vmatprep.subr.mxu1 %v2537_v0 }
 0x130   :  { %2010 = vmatpush3.msra.mxu1 %v2649_v3 }
 0x131   :  { %2011 = vmatprep.subr.mxu1 %v2537_v0 }
 0x132   :  { %2012 = vmatpush3.msra.mxu1 %v2655_v4  ;;  %v754_v41 = vld [vmem:[#allocation2] sm:$0xff] }
 0x133   :  { %2013 = vmatprep.subr.mxu1 %v2537_v0 }
 0x134   :  { %2014 = vmatpush3.msra.mxu1 %v2661_v5 }
 0x135   :  { %2015 = vmatprep.subr.mxu1 %v2537_v0 }
 0x136   :  { %2016 = vmatpush3.msra.mxu1 %v2667_v6 }
 0x137   :  { %2017 = vmatprep.subr.mxu1 %v2537_v0 }
 0x138   :  { %2018 = vmatpush3.msra.mxu1 %v2673_v7 }
 0x139   :  { %2019 = vmatprep.subr.mxu1 %v2537_v0 }
 0x13a   :  { %2020 = vmatpush3.msra.mxu1 %v2679_v8 }
 0x13b   :  { %2043 = vmatprep.subr.mxu1 %v2537_v0 }
 0x1eb   :  { %v285_v15 = vpop.f32.mrf.mxu1 }
 0x1ec   :  { %v289_v16 = vadd.f32 %v285_v15, %v215_v14 }
 0x1ed   :  { %v1985_v17 = vpop.f32.mrf.mxu1 }
 0x1ee   :  { %2347 = vtanh.f32 %v289_v16 }
 0x1fb   :  { %v2348_v18 = vpop.eup %2347 }
 0x1fc   :  { %291 = vst.msk [vmem:[#allocation2 + $0x8] sm:$0xff] %vm138_vm1, %v2348_v18  ;;  %2003 = vmatmul.mubr.msk.f32.vlgmr.msra.gmra.mxu0 %vm138_vm1, %v2348_v18 }
 0x1fd   :  { %2025 = vmatpush3.msra.mxu0 %v2642_v1  ;;  %2040 = vmatprep.mubr.msk.f32.mxu0 %vm2538_vm0, %v2537_v0 }
 0x1fe   :  { %2026 = vmatprep.subr.mxu0 %v2537_v0 }
 0x1ff   :  { %2027 = vmatpush3.msra.mxu0 %v2644_v2 }
 0x200   :  { %2028 = vmatprep.subr.mxu0 %v2537_v0 }
 0x201   :  { %2029 = vmatpush3.msra.mxu0 %v2649_v3 }
 0x202   :  { %2030 = vmatprep.subr.mxu0 %v2537_v0 }
 0x203   :  { %2031 = vmatpush3.msra.mxu0 %v2655_v4  ;;  %v755_v48 = vld [vmem:[#allocation2 + $0x8] sm:$0xff] }
 0x204   :  { %2032 = vmatprep.subr.mxu0 %v2537_v0 }
 0x205   :  { %2033 = vmatpush3.msra.mxu0 %v2661_v5 }
 0x206   :  { %2034 = vmatprep.subr.mxu0 %v2537_v0 }
 0x207   :  { %2035 = vmatpush3.msra.mxu0 %v2667_v6 }
 0x208   :  { %2036 = vmatprep.subr.mxu0 %v2537_v0 }
 0x209   :  { %2037 = vmatpush3.msra.mxu0 %v2673_v7 }
 0x20a   :  { %2038 = vmatprep.subr.mxu0 %v2537_v0 }
 0x20b   :  { %2039 = vmatpush3.msra.mxu0 %v2679_v8 }
 0x20c   :  { %2062 = vmatprep.subr.mxu0 %v2537_v0 }
 0x2bc   :  { %v362_v20 = vpop.f32.mrf.mxu0 }
 0x2bd   :  { %v366_v21 = vadd.f32 %v362_v20, %v292_v19 }
 0x2be   :  { %v2004_v22 = vpop.f32.mrf.mxu0 }
 0x2bf   :  { %2349 = vtanh.f32 %v366_v21 }
 0x2cc   :  { %v2350_v23 = vpop.eup %2349 }
 0x2cd   :  { %368 = vst.msk [vmem:[#allocation2 + $0x10] sm:$0xff] %vm138_vm1, %v2350_v23  ;;  %2022 = vmatmul.mubr.msk.f32.vlgmr.msra.gmra.mxu1 %vm138_vm1, %v2350_v23 }
 0x2ce   :  { %2044 = vmatpush3.msra.mxu1 %v2642_v1  ;;  %2059 = vmatprep.mubr.msk.f32.mxu1 %vm2538_vm0, %v2537_v0 }
 0x2cf   :  { %2045 = vmatprep.subr.mxu1 %v2537_v0 }
 0x2d0   :  { %2046 = vmatpush3.msra.mxu1 %v2644_v2 }
 0x2d1   :  { %2047 = vmatprep.subr.mxu1 %v2537_v0 }
 0x2d2   :  { %2048 = vmatpush3.msra.mxu1 %v2649_v3 }
 0x2d3   :  { %2049 = vmatprep.subr.mxu1 %v2537_v0 }
 0x2d4   :  { %2050 = vmatpush3.msra.mxu1 %v2655_v4  ;;  %v756_v49 = vld [vmem:[#allocation2 + $0x10] sm:$0xff] }
 0x2d5   :  { %2051 = vmatprep.subr.mxu1 %v2537_v0 }
 0x2d6   :  { %2052 = vmatpush3.msra.mxu1 %v2661_v5 }
 0x2d7   :  { %2053 = vmatprep.subr.mxu1 %v2537_v0 }
 0x2d8   :  { %2054 = vmatpush3.msra.mxu1 %v2667_v6 }
 0x2d9   :  { %2055 = vmatprep.subr.mxu1 %v2537_v0 }
 0x2da   :  { %2056 = vmatpush3.msra.mxu1 %v2673_v7 }
 0x2db   :  { %2057 = vmatprep.subr.mxu1 %v2537_v0 }
 0x2dc   :  { %2058 = vmatpush3.msra.mxu1 %v2679_v8 }
 0x2dd   :  { %2081 = vmatprep.subr.mxu1 %v2537_v0 }
 0x38d   :  { %v439_v25 = vpop.f32.mrf.mxu1 }
 0x38e   :  { %v443_v26 = vadd.f32 %v439_v25, %v369_v24 }
 0x38f   :  { %v2023_v27 = vpop.f32.mrf.mxu1 }
 0x390   :  { %2351 = vtanh.f32 %v443_v26 }
 0x39d   :  { %v2352_v28 = vpop.eup %2351 }
 0x39e   :  { %445 = vst.msk [vmem:[#allocation2 + $0x18] sm:$0xff] %vm138_vm1, %v2352_v28  ;;  %2041 = vmatmul.mubr.msk.f32.vlgmr.msra.gmra.mxu0 %vm138_vm1, %v2352_v28 }
 0x39f   :  { %2063 = vmatpush3.msra.mxu0 %v2642_v1  ;;  %2078 = vmatprep.mubr.msk.f32.mxu0 %vm2538_vm0, %v2537_v0 }
 0x3a0   :  { %2064 = vmatprep.subr.mxu0 %v2537_v0 }
 0x3a1   :  { %2065 = vmatpush3.msra.mxu0 %v2644_v2 }
 0x3a2   :  { %2066 = vmatprep.subr.mxu0 %v2537_v0 }
 0x3a3   :  { %2067 = vmatpush3.msra.mxu0 %v2649_v3 }
 0x3a4   :  { %2068 = vmatprep.subr.mxu0 %v2537_v0 }
 0x3a5   :  { %2069 = vmatpush3.msra.mxu0 %v2655_v4  ;;  %v757_v50 = vld [vmem:[#allocation2 + $0x18] sm:$0xff] }
 0x3a6   :  { %2070 = vmatprep.subr.mxu0 %v2537_v0 }
 0x3a7   :  { %2071 = vmatpush3.msra.mxu0 %v2661_v5 }
 0x3a8   :  { %2072 = vmatprep.subr.mxu0 %v2537_v0 }
 0x3a9   :  { %2073 = vmatpush3.msra.mxu0 %v2667_v6 }
 0x3aa   :  { %2074 = vmatprep.subr.mxu0 %v2537_v0 }
 0x3ab   :  { %2075 = vmatpush3.msra.mxu0 %v2673_v7 }
 0x3ac   :  { %2076 = vmatprep.subr.mxu0 %v2537_v0 }
 0x3ad   :  { %2077 = vmatpush3.msra.mxu0 %v2679_v8 }
 0x3ae   :  { %2100 = vmatprep.subr.mxu0 %v769_v34 }
 0x45e   :  { %v516_v30 = vpop.f32.mrf.mxu0 }
 0x45f   :  { %v520_v31 = vadd.f32 %v516_v30, %v446_v29 }
 0x460   :  { %v2042_v32 = vpop.f32.mrf.mxu0 }
 0x461   :  { %2353 = vtanh.f32 %v520_v31 }
 0x46e   :  { %v2354_v33 = vpop.eup %2353 }
 0x46f   :  { %522 = vst.msk [vmem:[#allocation2 + $0x20] sm:$0xff] %vm138_vm1, %v2354_v33  ;;  %2060 = vmatmul.mubr.msk.f32.vlgmr.msra.gmra.mxu1 %vm138_vm1, %v2354_v33 }
 0x470   :  { %2082 = vmatpush3.msra.mxu1 %v2642_v1  ;;  %2097 = vmatprep.mubr.msk.f32.mxu1 %vm2538_vm0, %v2537_v0 }
 0x471   :  { %2083 = vmatprep.subr.mxu1 %v2537_v0 }
 0x472   :  { %2084 = vmatpush3.msra.mxu1 %v2644_v2 }
 0x473   :  { %2085 = vmatprep.subr.mxu1 %v2537_v0 }
 0x474   :  { %2086 = vmatpush3.msra.mxu1 %v2649_v3 }
 0x475   :  { %2087 = vmatprep.subr.mxu1 %v2537_v0 }
 0x476   :  { %2088 = vmatpush3.msra.mxu1 %v2655_v4  ;;  %v758_v51 = vld [vmem:[#allocation2 + $0x20] sm:$0xff]  ;;  %v677_v4 = vld [vmem:[#allocation3 + $0x38] sm:$0xff] }
 0x477   :  { %2089 = vmatprep.subr.mxu1 %v2537_v0 }
 0x478   :  { %2090 = vmatpush3.msra.mxu1 %v2661_v5 }
 0x479   :  { %2091 = vmatprep.subr.mxu1 %v2537_v0 }
 0x47a   :  { %2092 = vmatpush3.msra.mxu1 %v2667_v6 }
 0x47b   :  { %2093 = vmatprep.subr.mxu1 %v2537_v0 }
 0x47c   :  { %2094 = vmatpush3.msra.mxu1 %v2673_v7 }
 0x47d   :  { %2095 = vmatprep.subr.mxu1 %v2537_v0 }
 0x47e   :  { %2096 = vmatpush3.msra.mxu1 %v2679_v8 }
 0x47f   :  { %2128 = vmatprep.subr.mxu1 %v2537_v0 }
 0x52f   :  { %v593_v36 = vpop.f32.mrf.mxu1 }
 0x530   :  { %v597_v37 = vadd.f32 %v593_v36, %v523_v35 }
 0x531   :  { %v2061_v38 = vpop.f32.mrf.mxu1 }
 0x532   :  { %2355 = vtanh.f32 %v597_v37 }
 0x53f   :  { %v2356_v39 = vpop.eup %2355 }
 0x540   :  { %599 = vst.msk [vmem:[#allocation2 + $0x28] sm:$0xff] %vm138_vm1, %v2356_v39  ;;  %2079 = vmatmul.mubr.msk.f32.vlgmr.msra.gmra.mxu0 %vm138_vm1, %v2356_v39 }
 0x541   :  { %2101 = vmatpush3.msra.mxu0 %v769_v34  ;;  %2116 = vmatprep.mubr.msk.f32.mxu0 %vm138_vm1, %v754_v41 }
 0x542   :  { %2102 = vmatprep.subr.mxu0 %v768_v40 }
 0x543   :  { %2103 = vmatpush3.msra.mxu0 %v768_v40 }
 0x544   :  { %2104 = vmatprep.subr.mxu0 %v767_v42 }
 0x545   :  { %2105 = vmatpush3.msra.mxu0 %v767_v42 }
 0x546   :  { %2106 = vmatprep.subr.mxu0 %v766_v43 }
 0x547   :  { %2107 = vmatpush3.msra.mxu0 %v766_v43  ;;  %v759_v52 = vld [vmem:[#allocation2 + $0x28] sm:$0xff] }
 0x548   :  { %2108 = vmatprep.subr.mxu0 %v765_v44 }
 0x549   :  { %2109 = vmatpush3.msra.mxu0 %v765_v44 }
 0x54a   :  { %2110 = vmatprep.subr.mxu0 %v764_v45 }
 0x54b   :  { %2111 = vmatpush3.msra.mxu0 %v764_v45 }
 0x54c   :  { %2112 = vmatprep.subr.mxu0 %v763_v46 }
 0x54d   :  { %2113 = vmatpush3.msra.mxu0 %v763_v46 }
 0x54e   :  { %2114 = vmatprep.subr.mxu0 %v762_v47 }
 0x54f   :  { %2115 = vmatpush3.msra.mxu0 %v762_v47 }
 0x550   :  { %2117 = vmatmul.mubr.msk.f32.vlgmr.msra.gmra.mxu0 %vm138_vm1, %v755_v48  ;;  %2147 = vmatprep.subr.mxu0 %v2537_v0 }
 0x551   :  { %2119 = vmatprep.mubr.msk.f32.mxu0 %vm138_vm1, %v756_v49  ;;  %2148 = vmatpush3.msra.mxu0 %v2817_v53 }
 0x552   :  { %2149 = vmatprep.subr.mxu0 %v2537_v0 }
 0x553   :  { %2150 = vmatpush3.msra.mxu0 %v2820_v54 }
 0x554   :  { %2120 = vmatmul.mubr.msk.f32.gmra.mxu0 %vm138_vm1, %v757_v50  ;;  %2151 = vmatprep.subr.mxu0 %v2537_v0 }
 0x555   :  { %2122 = vmatprep.mubr.msk.f32.mxu0 %vm138_vm1, %v758_v51  ;;  %2152 = vmatpush3.msra.mxu0 %v2824_v55 }
 0x556   :  { %2153 = vmatprep.subr.mxu0 %v2537_v0 }
 0x557   :  { %2154 = vmatpush3.msra.mxu0 %v2828_v56 }
 0x558   :  { %2123 = vmatmul.mubr.msk.f32.gmra.mxu0 %vm138_vm1, %v759_v52  ;;  %2155 = vmatprep.subr.mxu0 %v2537_v0 }
 0x559   :  { %2156 = vmatpush3.msra.mxu0 %v2832_v57 }
 0x55a   :  { %2157 = vmatprep.subr.mxu0 %v2537_v0 }
 0x55b   :  { %2158 = vmatpush3.msra.mxu0 %v2836_v58 }
 0x55c   :  { %2159 = vmatprep.subr.mxu0 %v2537_v0 }
 0x55d   :  { %2160 = vmatpush3.msra.mxu0 %v2840_v59 }
 0x55e   :  { %2161 = vmatprep.subr.mxu0 %v2537_v0 }
 0x55f   :  { %2162 = vmatpush3.msra.mxu0 %v2844_v60 }
 0x560   :  { %2185 = vmatprep.subr.mxu0 %v2537_v0 }
 0x600   :  { %v670_v62 = vpop.f32.mrf.mxu0 }
 0x601   :  { %v674_v63 = vadd.f32 %v670_v62, %v600_v61 }
 0x602   :  { %v2080_v1 = vpop.f32.mrf.mxu0 }
 0x603   :  { %2357 = vtanh.f32 %v674_v63 }
 0x610   :  { %v2358_v2 = vpop.eup %2357  ;;  %v2118_v8 = vpop.f32.mrf.mxu0 }
 0x611   :  { %676 = vst.msk [vmem:[#allocation2 + $0x30] sm:$0xff] %vm138_vm1, %v2358_v2  ;;  %2098 = vmatmul.mubr.msk.f32.vlgmr.msra.gmra.mxu1 %vm138_vm1, %v2358_v2  ;;  %v873_v24 = vadd.f32 %v2118_v8, %v2892_v10  ;;  %v1540_v2 = vld [vmem:[#allocation11 + $0x38] sm:$0xff]  ;;  %v1534_v8 = vld [vmem:[#allocation11 + $0x8] sm:$0xff] }
 0x612   :  { %2129 = vmatpush3.msra.mxu1 %v2817_v53  ;;  %2144 = vmatprep.mubr.msk.f32.mxu1 %vm2538_vm0, %v2537_v0  ;;  %v867_v9 = vpop.f32.mrf.mxu0 }
 0x613   :  { %2130 = vmatprep.subr.mxu1 %v2537_v0  ;;  %v868_v11 = vadd.f32 %v2892_v10, %v867_v9  ;;  %v1533_v9 = vld [vmem:[#allocation11] sm:$0xff] }
 0x614   :  { %2131 = vmatpush3.msra.mxu1 %v2820_v54  ;;  %v2121_v18 = vpop.f32.mrf.mxu0 }
 0x615   :  { %2132 = vmatprep.subr.mxu1 %v2537_v0  ;;  %v883_v34 = vadd.f32 %v2121_v18, %v2892_v10  ;;  %v1629_v18 = vld [vmem:[#allocation12 + $0x38] sm:$0xff] }
 0x616   :  { %2133 = vmatpush3.msra.mxu1 %v2824_v55  ;;  %v877_v19 = vpop.f32.mrf.mxu0 }
 0x617   :  { %2134 = vmatprep.subr.mxu1 %v2537_v0  ;;  %v878_v29 = vadd.f32 %v2892_v10, %v877_v19  ;;  %v1628_v19 = vld [vmem:[#allocation12 + $0x30] sm:$0xff] }
 0x618   :  { %2135 = vmatpush3.msra.mxu1 %v2828_v56  ;;  %v760_v3 = vld [vmem:[#allocation2 + $0x30] sm:$0xff]  ;;  %v2918_v20 = vpop.f32.mrf.mxu0 }
 0x619   :  { %2136 = vmatprep.subr.mxu1 %v2537_v0  ;;  %2125 = vmatprep.mubr.msk.f32.mxu0 %vm138_vm1, %v760_v3  ;;  %v893_v44 = vadd.f32 %v2918_v20, %v2892_v10  ;;  %v1539_v3 = vld [vmem:[#allocation11 + $0x30] sm:$0xff]  ;;  %v1627_v20 = vld [vmem:[#allocation12 + $0x28] sm:$0xff] }
 0x61a   :  { %2137 = vmatpush3.msra.mxu1 %v2832_v57  ;;  %v2920_v21 = vpop.f32.mrf.mxu0 }
 0x61b   :  { %2138 = vmatprep.subr.mxu1 %v2537_v0  ;;  %v888_v39 = vadd.f32 %v2892_v10, %v2920_v21  ;;  %v1626_v21 = vld [vmem:[#allocation12 + $0x20] sm:$0xff] }
 0x61c   :  { %2139 = vmatpush3.msra.mxu1 %v2836_v58 }
 0x61d   :  { %2140 = vmatprep.subr.mxu1 %v2537_v0 }
 0x61e   :  { %2141 = vmatpush3.msra.mxu1 %v2840_v59 }
 0x61f   :  { %2142 = vmatprep.subr.mxu1 %v2537_v0 }
 0x620   :  { %2143 = vmatpush3.msra.mxu1 %v2844_v60 }
 0x621   :  { %2145 = vmatmul.mubr.f32.vlgmr.msra.gmra.mxu1 %v2537_v0  ;;  %2166 = vmatprep.subr.mxu1 %v2537_v0 }
 0x622   :  { %2167 = vmatpush3.msra.mxu1 %v2817_v53  ;;  %2182 = vmatprep.mubr.msk.f32.mxu1 %vm2538_vm0, %v2537_v0 }
 0x623   :  { %2168 = vmatprep.subr.mxu1 %v2537_v0 }
 0x624   :  { %2169 = vmatpush3.msra.mxu1 %v2820_v54 }
 0x625   :  { %2170 = vmatprep.subr.mxu1 %v2537_v0 }
 0x626   :  { %2171 = vmatpush3.msra.mxu1 %v2824_v55 }
 0x627   :  { %2172 = vmatprep.subr.mxu1 %v2537_v0 }
 0x628   :  { %2173 = vmatpush3.msra.mxu1 %v2828_v56 }
 0x629   :  { %2174 = vmatprep.subr.mxu1 %v2537_v0 }
 0x62a   :  { %2175 = vmatpush3.msra.mxu1 %v2832_v57 }
 0x62b   :  { %2176 = vmatprep.subr.mxu1 %v2537_v0 }
 0x62c   :  { %2177 = vmatpush3.msra.mxu1 %v2836_v58 }
 0x62d   :  { %2178 = vmatprep.subr.mxu1 %v2537_v0 }
 0x62e   :  { %2179 = vmatpush3.msra.mxu1 %v2840_v59 }
 0x62f   :  { %2180 = vmatprep.subr.mxu1 %v2537_v0 }
 0x630   :  { %2181 = vmatpush3.msra.mxu1 %v2844_v60 }
 0x631   :  { %2204 = vmatprep.subr.mxu1 %v2537_v0 }
 0x6d1   :  { %v747_v5 = vpop.f32.mrf.mxu1 }
 0x6d2   :  { %v751_v6 = vadd.f32 %v747_v5, %v677_v4  ;;  %v1538_v4 = vld [vmem:[#allocation11 + $0x28] sm:$0xff]  ;;  %v1537_v5 = vld [vmem:[#allocation11 + $0x20] sm:$0xff] }
 0x6d3   :  { %v2099_v7 = vpop.f32.mrf.mxu1 }
 0x6d4   :  { %2359 = vtanh.f32 %v751_v6  ;;  %v1536_v6 = vld [vmem:[#allocation11 + $0x18] sm:$0xff]  ;;  %v1535_v7 = vld [vmem:[#allocation11 + $0x10] sm:$0xff] }
 0x6e1   :  { %v2360_v12 = vpop.eup %2359  ;;  %v972_v13 = vpop.f32.mrf.mxu1 }
 0x6e2   :  { %753 = vst.msk [vmem:[#allocation2 + $0x38] sm:$0xff] %vm138_vm1, %v2360_v12  ;;  %v976_v14 = vadd.f32 %v972_v13, %v868_v11  ;;  %v1636_v11 = vld [vmem:[#allocation12 + $0x70] sm:$0xff]  ;;  %v1635_v12 = vld [vmem:[#allocation12 + $0x68] sm:$0xff]  ;;  %v1634_v13 = vld [vmem:[#allocation12 + $0x60] sm:$0xff] }
 0x6e3   :  { %v2146_v15 = vpop.f32.mrf.mxu1 }
 0x6e4   :  { %2361 = vtanh.f32 %v976_v14  ;;  %v1633_v14 = vld [vmem:[#allocation12 + $0x58] sm:$0xff]  ;;  %v1632_v15 = vld [vmem:[#allocation12 + $0x50] sm:$0xff] }
 0x6e9   :  { %v761_v16 = vld [vmem:[#allocation2 + $0x38] sm:$0xff] }
 0x6ea   :  { %2126 = vmatmul.mubr.msk.f32.gmra.mxu0 %vm138_vm1, %v761_v16  ;;  %v1631_v16 = vld [vmem:[#allocation12 + $0x48] sm:$0xff] }
 0x6eb   :  { %2163 = vmatprep.mubr.msk.f32.mxu0 %vm2538_vm0, %v2537_v0 }
 0x6f1   :  { %v2362_v17 = vpop.eup %2361 }
 0x6f2   :  { %2164 = vmatmul.mubr.msk.f32.vlgmr.msra.gmra.mxu0 %vm138_vm1, %v2362_v17  ;;  %v1630_v17 = vld [vmem:[#allocation12 + $0x40] sm:$0xff] }
 0x6f3   :  { %2186 = vmatpush3.msra.mxu0 %v2817_v53  ;;  %2201 = vmatprep.mubr.msk.f32.mxu0 %vm2538_vm0, %v2537_v0 }
 0x6f4   :  { %2187 = vmatprep.subr.mxu0 %v2537_v0 }
 0x6f5   :  { %2188 = vmatpush3.msra.mxu0 %v2820_v54 }
 0x6f6   :  { %2189 = vmatprep.subr.mxu0 %v2537_v0 }
 0x6f7   :  { %2190 = vmatpush3.msra.mxu0 %v2824_v55 }
 0x6f8   :  { %2191 = vmatprep.subr.mxu0 %v2537_v0 }
 0x6f9   :  { %2192 = vmatpush3.msra.mxu0 %v2828_v56 }
 0x6fa   :  { %2193 = vmatprep.subr.mxu0 %v2537_v0 }
 0x6fb   :  { %2194 = vmatpush3.msra.mxu0 %v2832_v57 }
 0x6fc   :  { %2195 = vmatprep.subr.mxu0 %v2537_v0 }
 0x6fd   :  { %2196 = vmatpush3.msra.mxu0 %v2836_v58 }
 0x6fe   :  { %2197 = vmatprep.subr.mxu0 %v2537_v0 }
 0x6ff   :  { %2198 = vmatpush3.msra.mxu0 %v2840_v59 }
 0x700   :  { %2199 = vmatprep.subr.mxu0 %v2537_v0 }
 0x701   :  { %2200 = vmatpush3.msra.mxu0 %v2844_v60 }
 0x702   :  { %2223 = vmatprep.subr.mxu0 %v2537_v0 }
 0x7aa   :  { %v2922_v22 = vpop.f32.mrf.mxu0 }
 0x7ac   :  { %v2924_v23 = vpop.f32.mrf.mxu0 }
 0x7ad   :  { %v898_v49 = vadd.f32 %v2892_v10, %v2924_v23 }
 0x7b2   :  { %v1047_v25 = vpop.f32.mrf.mxu0 }
 0x7b3   :  { %v1051_v26 = vadd.f32 %v1047_v25, %v873_v24 }
 0x7b4   :  { %v2165_v27 = vpop.f32.mrf.mxu0 }
 0x7b5   :  { %2363 = vtanh.f32 %v1051_v26  ;;  %v1757_v27 = vld [vmem:[%s3069_s5] ss:$0 sm:$0xff] }
 0x7c2   :  { %v2364_v28 = vpop.eup %2363 }
 0x7c3   :  { %2183 = vmatmul.mubr.msk.f32.vlgmr.msra.gmra.mxu1 %vm138_vm1, %v2364_v28 }
 0x7c4   :  { %2205 = vmatpush3.msra.mxu1 %v2817_v53  ;;  %2220 = vmatprep.mubr.msk.f32.mxu1 %vm2538_vm0, %v2537_v0 }
 0x7c5   :  { %2206 = vmatprep.subr.mxu1 %v2537_v0 }
 0x7c6   :  { %2207 = vmatpush3.msra.mxu1 %v2820_v54 }
 0x7c7   :  { %2208 = vmatprep.subr.mxu1 %v2537_v0 }
 0x7c8   :  { %2209 = vmatpush3.msra.mxu1 %v2824_v55 }
 0x7c9   :  { %2210 = vmatprep.subr.mxu1 %v2537_v0 }
 0x7ca   :  { %2211 = vmatpush3.msra.mxu1 %v2828_v56 }
 0x7cb   :  { %2212 = vmatprep.subr.mxu1 %v2537_v0 }
 0x7cc   :  { %2213 = vmatpush3.msra.mxu1 %v2832_v57 }
 0x7cd   :  { %2214 = vmatprep.subr.mxu1 %v2537_v0 }
 0x7ce   :  { %2215 = vmatpush3.msra.mxu1 %v2836_v58 }
 0x7cf   :  { %2216 = vmatprep.subr.mxu1 %v2537_v0 }
 0x7d0   :  { %2217 = vmatpush3.msra.mxu1 %v2840_v59 }
 0x7d1   :  { %2218 = vmatprep.subr.mxu1 %v2537_v0 }
 0x7d2   :  { %2219 = vmatpush3.msra.mxu1 %v2844_v60 }
 0x7d3   :  { %2242 = vmatprep.subr.mxu1 %v2537_v0 }
 0x883   :  { %v1122_v30 = vpop.f32.mrf.mxu1 }
 0x884   :  { %v1126_v31 = vadd.f32 %v1122_v30, %v878_v29  ;;  %v1758_v29 = vld [vmem:[%s3070_s6] ss:$0 sm:$0xff] }
 0x885   :  { %v2184_v32 = vpop.f32.mrf.mxu1 }
 0x886   :  { %2365 = vtanh.f32 %v1126_v31  ;;  %v1624_v32 = vld [vmem:[#allocation12 + $0x10] sm:$0xff] }
 0x893   :  { %v2366_v33 = vpop.eup %2365 }
 0x894   :  { %2202 = vmatmul.mubr.msk.f32.vlgmr.msra.gmra.mxu0 %vm138_vm1, %v2366_v33  ;;  %v1623_v33 = vld [vmem:[#allocation12 + $0x8] sm:$0xff] }
 0x895   :  { %2224 = vmatpush3.msra.mxu0 %v2817_v53  ;;  %2239 = vmatprep.mubr.msk.f32.mxu0 %vm2538_vm0, %v2537_v0 }
 0x896   :  { %2225 = vmatprep.subr.mxu0 %v2537_v0 }
 0x897   :  { %2226 = vmatpush3.msra.mxu0 %v2820_v54 }
 0x898   :  { %2227 = vmatprep.subr.mxu0 %v2537_v0 }
 0x899   :  { %2228 = vmatpush3.msra.mxu0 %v2824_v55 }
 0x89a   :  { %2229 = vmatprep.subr.mxu0 %v2537_v0 }
 0x89b   :  { %2230 = vmatpush3.msra.mxu0 %v2828_v56 }
 0x89c   :  { %2231 = vmatprep.subr.mxu0 %v2537_v0 }
 0x89d   :  { %2232 = vmatpush3.msra.mxu0 %v2832_v57 }
 0x89e   :  { %2233 = vmatprep.subr.mxu0 %v2537_v0 }
 0x89f   :  { %2234 = vmatpush3.msra.mxu0 %v2836_v58 }
 0x8a0   :  { %2235 = vmatprep.subr.mxu0 %v2537_v0 }
 0x8a1   :  { %2236 = vmatpush3.msra.mxu0 %v2840_v59 }
 0x8a2   :  { %2237 = vmatprep.subr.mxu0 %v2537_v0 }
 0x8a3   :  { %2238 = vmatpush3.msra.mxu0 %v2844_v60 }
 0x8a4   :  { %2261 = vmatprep.subr.mxu0 %v2537_v0 }
 0x954   :  { %v1197_v35 = vpop.f32.mrf.mxu0 }
 0x955   :  { %v1201_v36 = vadd.f32 %v1197_v35, %v883_v34  ;;  %v1622_v34 = vld [vmem:[#allocation12] sm:$0xff] }
 0x956   :  { %v2203_v37 = vpop.f32.mrf.mxu0  ;;  %v1759_v35 = vld [vmem:[%s3072_s8] ss:$0 sm:$0xff] }
 0x957   :  { %2367 = vtanh.f32 %v1201_v36 }
 0x964   :  { %v2368_v38 = vpop.eup %2367 }
 0x965   :  { %2221 = vmatmul.mubr.msk.f32.vlgmr.msra.gmra.mxu1 %vm138_vm1, %v2368_v38 }
 0x966   :  { %2243 = vmatpush3.msra.mxu1 %v2817_v53  ;;  %2258 = vmatprep.mubr.msk.f32.mxu1 %vm2538_vm0, %v2537_v0 }
 0x967   :  { %2244 = vmatprep.subr.mxu1 %v2537_v0 }
 0x968   :  { %2245 = vmatpush3.msra.mxu1 %v2820_v54 }
 0x969   :  { %2246 = vmatprep.subr.mxu1 %v2537_v0 }
 0x96a   :  { %2247 = vmatpush3.msra.mxu1 %v2824_v55 }
 0x96b   :  { %2248 = vmatprep.subr.mxu1 %v2537_v0 }
 0x96c   :  { %2249 = vmatpush3.msra.mxu1 %v2828_v56 }
 0x96d   :  { %2250 = vmatprep.subr.mxu1 %v2537_v0 }
 0x96e   :  { %2251 = vmatpush3.msra.mxu1 %v2832_v57 }
 0x96f   :  { %2252 = vmatprep.subr.mxu1 %v2537_v0 }
 0x970   :  { %2253 = vmatpush3.msra.mxu1 %v2836_v58 }
 0x971   :  { %2254 = vmatprep.subr.mxu1 %v2537_v0 }
 0x972   :  { %2255 = vmatpush3.msra.mxu1 %v2840_v59 }
 0x973   :  { %2256 = vmatprep.subr.mxu1 %v2537_v0 }
 0x974   :  { %2257 = vmatpush3.msra.mxu1 %v2844_v60 }
 0x975   :  { %2280 = vmatprep.subr.mxu1 %v2537_v0 }
 0xa25   :  { %v1272_v40 = vpop.f32.mrf.mxu1 }
 0xa26   :  { %v1276_v41 = vadd.f32 %v1272_v40, %v888_v39  ;;  %v1761_v40 = vld [vmem:[%s3074_s10] ss:$0 sm:$0xff] }
 0xa27   :  { %v2222_v42 = vpop.f32.mrf.mxu1 }
 0xa28   :  { %2369 = vtanh.f32 %v1276_v41 }
 0xa35   :  { %v2370_v43 = vpop.eup %2369 }
 0xa36   :  { %2240 = vmatmul.mubr.msk.f32.vlgmr.msra.gmra.mxu0 %vm138_vm1, %v2370_v43 }
 0xa37   :  { %2262 = vmatpush3.msra.mxu0 %v2817_v53  ;;  %2277 = vmatprep.mubr.msk.f32.mxu0 %vm2538_vm0, %v2537_v0 }
 0xa38   :  { %2263 = vmatprep.subr.mxu0 %v2537_v0 }
 0xa39   :  { %2264 = vmatpush3.msra.mxu0 %v2820_v54  ;;  %v903_v54 = vadd.f32 %v2922_v22, %v2892_v10  ;;  %v1637_v10 = vld [vmem:[#allocation12 + $0x78] sm:$0xff] }
 0xa3a   :  { %2265 = vmatprep.subr.mxu0 %v2537_v0  ;;  %v1625_v22 = vld [vmem:[#allocation12 + $0x18] sm:$0xff] }
 0xa3b   :  { %2266 = vmatpush3.msra.mxu0 %v2824_v55 }
 0xa3c   :  { %2267 = vmatprep.subr.mxu0 %v2537_v0 }
 0xa3d   :  { %2268 = vmatpush3.msra.mxu0 %v2828_v56 }
 0xa3e   :  { %2269 = vmatprep.subr.mxu0 %v2537_v0 }
 0xa3f   :  { %2270 = vmatpush3.msra.mxu0 %v2832_v57 }
 0xa40   :  { %2271 = vmatprep.subr.mxu0 %v2537_v0 }
 0xa41   :  { %2272 = vmatpush3.msra.mxu0 %v2836_v58 }
 0xa42   :  { %2273 = vmatprep.subr.mxu0 %v2537_v0 }
 0xa43   :  { %2274 = vmatpush3.msra.mxu0 %v2840_v59 }
 0xa44   :  { %2275 = vmatprep.subr.mxu0 %v2537_v0 }
 0xa45   :  { %2276 = vmatpush3.msra.mxu0 %v2844_v60 }
 0xa46   :  { %2299 = vmatprep.subr.mxu0 %v2537_v0 }
 0xaf6   :  { %v1347_v45 = vpop.f32.mrf.mxu0 }
 0xaf7   :  { %v1351_v46 = vadd.f32 %v1347_v45, %v893_v44 }
 0xaf8   :  { %v2241_v47 = vpop.f32.mrf.mxu0 }
 0xaf9   :  { %2371 = vtanh.f32 %v1351_v46 }
 0xb06   :  { %v2372_v48 = vpop.eup %2371 }
 0xb07   :  { %2259 = vmatmul.mubr.msk.f32.vlgmr.msra.gmra.mxu1 %vm138_vm1, %v2372_v48 }
 0xb08   :  { %2296 = vmatprep.mubr.msk.f32.mxu1 %vm2538_vm0, %v2537_v0  ;;  %2281 = vmatpush3.msra.mxu1 %v1540_v2 }
 0xb09   :  { %2282 = vmatprep.subr.mxu1 %v2537_v0 }
 0xb0a   :  { %2283 = vmatpush3.msra.mxu1 %v1539_v3 }
 0xb0b   :  { %2284 = vmatprep.subr.mxu1 %v2537_v0 }
 0xb0c   :  { %2285 = vmatpush3.msra.mxu1 %v1538_v4 }
 0xb0d   :  { %2286 = vmatprep.subr.mxu1 %v2537_v0 }
 0xb0e   :  { %2287 = vmatpush3.msra.mxu1 %v1537_v5 }
 0xb0f   :  { %2288 = vmatprep.subr.mxu1 %v2537_v0 }
 0xb10   :  { %2289 = vmatpush3.msra.mxu1 %v1536_v6 }
 0xb11   :  { %2290 = vmatprep.subr.mxu1 %v2537_v0 }
 0xb12   :  { %2291 = vmatpush3.msra.mxu1 %v1535_v7 }
 0xb13   :  { %2292 = vmatprep.subr.mxu1 %v2537_v0 }
 0xb14   :  { %2293 = vmatpush3.msra.mxu1 %v1534_v8 }
 0xb15   :  { %2294 = vmatprep.subr.mxu1 %v2537_v0 }
 0xb16   :  { %2295 = vmatpush3.msra.mxu1 %v1533_v9 }
 0xbc7   :  { %v1422_v50 = vpop.f32.mrf.mxu1 }
 0xbc8   :  { %v1426_v51 = vadd.f32 %v1422_v50, %v898_v49 }
 0xbc9   :  { %v2260_v52 = vpop.f32.mrf.mxu1 }
 0xbca   :  { %2373 = vtanh.f32 %v1426_v51 }
 0xbd7   :  { %v2374_v53 = vpop.eup %2373 }
 0xbd8   :  { %2278 = vmatmul.mubr.msk.f32.vlgmr.msra.gmra.mxu0 %vm138_vm1, %v2374_v53 }
 0xbd9   :  { %2331 = vmatprep.mubr.msk.f32.mxu0 %vm2538_vm0, %v2537_v0  ;;  %2300 = vmatpush3.msra.mxu0 %v1637_v10 }
 0xbda   :  { %2301 = vmatprep.subr.mxu0 %v2537_v0 }
 0xbdb   :  { %2302 = vmatpush3.msra.mxu0 %v1636_v11 }
 0xbdc   :  { %2303 = vmatprep.subr.mxu0 %v2537_v0 }
 0xbdd   :  { %2304 = vmatpush3.msra.mxu0 %v1635_v12 }
 0xbde   :  { %2305 = vmatprep.subr.mxu0 %v2537_v0 }
 0xbdf   :  { %2306 = vmatpush3.msra.mxu0 %v1634_v13 }
 0xbe0   :  { %2307 = vmatprep.subr.mxu0 %v2537_v0 }
 0xbe1   :  { %2308 = vmatpush3.msra.mxu0 %v1633_v14 }
 0xbe2   :  { %2309 = vmatprep.subr.mxu0 %v2537_v0 }
 0xbe3   :  { %2310 = vmatpush3.msra.mxu0 %v1632_v15 }
 0xbe4   :  { %2311 = vmatprep.subr.mxu0 %v2537_v0 }
 0xbe5   :  { %2312 = vmatpush3.msra.mxu0 %v1631_v16 }
 0xbe6   :  { %2313 = vmatprep.subr.mxu0 %v2537_v0 }
 0xbe7   :  { %2314 = vmatpush3.msra.mxu0 %v1630_v17 }
 0xbe8   :  { %2315 = vmatprep.subr.mxu0 %v2537_v0 }
 0xbe9   :  { %2316 = vmatpush3.msra.mxu0 %v1629_v18 }
 0xbea   :  { %2317 = vmatprep.subr.mxu0 %v2537_v0 }
 0xbeb   :  { %2318 = vmatpush3.msra.mxu0 %v1628_v19 }
 0xbec   :  { %2319 = vmatprep.subr.mxu0 %v2537_v0 }
 0xbed   :  { %2320 = vmatpush3.msra.mxu0 %v1627_v20 }
 0xbee   :  { %2321 = vmatprep.subr.mxu0 %v2537_v0 }
 0xbef   :  { %2322 = vmatpush3.msra.mxu0 %v1626_v21 }
 0xbf0   :  { %2323 = vmatprep.subr.mxu0 %v2537_v0 }
 0xbf1   :  { %2324 = vmatpush3.msra.mxu0 %v1625_v22 }
 0xbf2   :  { %2325 = vmatprep.subr.mxu0 %v2537_v0 }
 0xbf3   :  { %2326 = vmatpush3.msra.mxu0 %v1624_v32 }
 0xbf4   :  { %2327 = vmatprep.subr.mxu0 %v2537_v0 }
 0xbf5   :  { %2328 = vmatpush3.msra.mxu0 %v1623_v33 }
 0xbf6   :  { %2329 = vmatprep.subr.mxu0 %v2537_v0 }
 0xbf7   :  { %2330 = vmatpush3.msra.mxu0 %v1622_v34 }
 0xc98   :  { %v1497_v55 = vpop.f32.mrf.mxu0 }
 0xc99   :  { %v1501_v56 = vadd.f32 %v1497_v55, %v903_v54 }
 0xc9a   :  { %v2279_v57 = vpop.f32.mrf.mxu0 }
 0xc9b   :  { %2375 = vtanh.f32 %v1501_v56 }
 0xca8   :  { %v2376_v58 = vpop.eup %2375 }
 0xca9   :  { %v1503_v59 = vsel %vm138_vm1, %v2376_v58, 0.0 }
 0xcaa   :  { %1504 = vadd.xlane.f32.xlu0 %v1503_v59 }
 0xd33   :  { %v1505_v60 = vpop.xlane.xlu0 %1504 }
 0xd34   :  { %v1507_v61 = vmul.f32 0.015625, %v1505_v60 }
 0xd36   :  { %v3020_v62 = vsub.f32 %v2376_v58, %v1507_v61 }
 0xd38   :  { %v1509_v63 = vmul.f32 %v3020_v62, %v3020_v62 }
 0xd3a   :  { %v1510_v1 = vsel %vm138_vm1, %v1509_v63, 0.0 }
 0xd3b   :  { %1511 = vadd.xlane.f32.xlu0 %v1510_v1 }
 0xdc4   :  { %v1512_v23 = vpop.xlane.xlu0 %1511 }
 0xdc5   :  { %v1513_v24 = vmul.f32 0.015625, %v1512_v23 }
 0xdc7   :  { %v1514_v25 = vadd.f32 1e-05, %v1513_v24 }
 0xdc9   :  { %2377 = vrsqrt.f32 %v1514_v25 }
 0xdd6   :  { %v2378_v26 = vpop.eup %2377 }
 0xdd7   :  { %v1516_v28 = vmul.f32 %v2378_v26, %v3020_v62 }
 0xdd9   :  { %v1524_v30 = vmul.f32 %v1757_v27, %v1516_v28 }
 0xddb   :  { %v1532_v31 = vadd.f32 %v1758_v29, %v1524_v30 }
 0xddd   :  { %2297 = vmatmul.mubr.msk.f32.vlgmr.msra.gmra.mxu1 %vm138_vm1, %v1532_v31 }
 0xe9d   :  { %v1617_v36 = vpop.f32.mrf.mxu1 }
 0xe9e   :  { %v1618_v37 = vadd.f32 %v1759_v35, %v1617_v36 }
 0xe9f   :  { %v2298_v38 = vpop.f32.mrf.mxu1 }
 0xea0   :  { %v1621_v39 = vmax.f32 %v1618_v37, 0.0 }
 0xea2   :  { %2332 = vmatmul.mubr.f32.vlgmr.msra.gmra.mxu0 %v1621_v39 }
 0xf62   :  { %v1711_v41 = vpop.f32.mrf.mxu0 }
 0xf63   :  { %v1712_v42 = vadd.f32 %v1761_v40, %v1711_v41 }
 0xf64   :  { %v2333_v0 = vpop.f32.mrf.mxu0 }
 0xf65   :  { %1715 = vst [vmem:[#allocation14] sm:$0xff] %v1712_v42 }
 0xf66   :  { %2510 = shalt.err (!%p2507_p6)
}
 0xf67   :  { %1725 = dma.vmem_to_hbm [thread:$0]  %s1723_s13, 128, %s3075_s11, [#allocation5]  }
 0xf68   :  { %2527 = dma.done.wait [#allocation5], 128  }
 0xf69   :  { %2528 = vsyncadd [#allocation5], 4294967168 }
 0xf6a   :  { %1729 = vsyncpa [#allocation4], 1 }
 0xf6b   :  { %1730 = vsyncpa [#allocation7], 1 }
 0xf6c   :  { %1731 = vsyncpa [#allocation10], 1 }
 0xf6d   :  { %1732 = vsyncpa [#allocation13], 1 }
 0xf6e   :  { %1733 = vsyncpa [#allocation5], 1 }

</bundles_post_ra>
